<compile_context>
chip_gen: v5e
topology: v5e:2x2
jax: 0.10.0
libtpu: 0.0.40
codegen_flags: <defaults>
</compile_context>

<pallas_src>
import jax
import jax.numpy as jnp
from jax.experimental import pallas as pl
from jax.experimental.pallas import tpu as pltpu


def _round_up(n, m):
    return ((n + m - 1) // m) * m


def net_2hidden_forward(x, params, *, tile_m=2048, bf16_matmul=False):
    """Fused 2-hidden-layer MLP forward pass as a batch-tiled Pallas TPU kernel.

    x:      (B, indim) float32
    params: dict with w1 (indim,h0), b1 (1,h0), w2 (h0,h1), b2 (1,h1),
            w3 (h1,outdim), b3 (1,outdim)   (i.e. weights are (fan_in, fan_out))
    """
    w1, b1 = params["w1"], params["b1"]
    w2, b2 = params["w2"], params["b2"]
    w3, b3 = params["w3"], params["b3"]

    B, indim = x.shape
    h0 = w1.shape[1]
    h1 = w2.shape[1]
    outdim = w3.shape[1]

    # Tile size along the (lane-mapped) batch axis: multiple of 128, large
    # enough to amortize per-step pipeline overhead, clamped for small batches.
    tm = max(128, min(_round_up(tile_m, 128), _round_up(B, 128)))
    b_pad = _round_up(B, tm)

    # Transposed layout: batch on lanes.  Zero-pad the batch to a tile multiple
    # (padded columns compute finite garbage and are sliced off at the end).
    x_t = jnp.pad(x.T, ((0, 0), (0, b_pad - B)))           # (indim, B_pad)

    w1_t = w1.T                                            # (h0, indim)
    b1_t = b1.reshape(h0, 1)
    w2_t = w2.T                                            # (h1, h0)
    b2_t = b2.reshape(h1, 1)
    # Last layer: pass the (h1, 1) column for the VPU+reduce path when
    # outdim == 1, otherwise the transposed (outdim, h1) matrix for the MXU.
    w3_k = w3 if outdim == 1 else w3.T
    b3_t = b3.reshape(outdim, 1)

    mm_dtype = jnp.bfloat16 if bf16_matmul else x.dtype

    def kernel(x_ref, w1_ref, b1_ref, w2_ref, b2_ref, w3_ref, b3_ref, o_ref):
        x_blk = x_ref[...]                                 # (indim, tm)

        # Layer 1: K == indim (typically 1) -> VPU broadcast outer product
        # instead of a <1%-utilized MXU pass.
        if indim == 1:
            h = w1_ref[...] * x_blk                        # (h0,1)*(1,tm) -> (h0,tm)
        else:
            h = jnp.dot(w1_ref[...], x_blk, preferred_element_type=jnp.float32)
        h = jnp.tanh(h + b1_ref[...])

        # Layer 2: the only real MXU matmul, (h1,h0) @ (h0,tm), f32 accumulate.
        h2 = jnp.dot(w2_ref[...].astype(mm_dtype), h.astype(mm_dtype),
                     preferred_element_type=jnp.float32)
        h2 = jnp.tanh(h2 + b2_ref[...])

        # Layer 3: N == outdim (typically 1) -> VPU multiply + sublane reduce,
        # producing a lane-dense (1, tm) block (unmasked stores).
        if outdim == 1:
            out = jnp.sum(w3_ref[...] * h2, axis=0, keepdims=True)
        else:
            out = jnp.dot(w3_ref[...], h2, preferred_element_type=jnp.float32)
        o_ref[...] = (out + b3_ref[...]).astype(o_ref.dtype)

    def resident(a):
        # Full-array block, same block every grid step -> stays in VMEM.
        return pl.BlockSpec(a.shape, lambda i: (0,) * a.ndim)

    n_weight_elems = w1.size + b1.size + w2.size + b2.size + w3.size + b3.size
    cost = pl.CostEstimate(
        flops=2 * b_pad * (indim * h0 + h0 * h1 + h1 * outdim),
        transcendentals=b_pad * (h0 + h1),
        bytes_accessed=4 * (b_pad * (indim + outdim) + n_weight_elems),
    )

    out_t = pl.pallas_call(
        kernel,
        out_shape=jax.ShapeDtypeStruct((outdim, b_pad), x.dtype),
        grid=(b_pad // tm,),
        in_specs=[
            pl.BlockSpec((indim, tm), lambda i: (0, i)),   # x streams, batch on lanes
            resident(w1_t), resident(b1_t),
            resident(w2_t), resident(b2_t),
            resident(w3_k), resident(b3_t),
        ],
        out_specs=pl.BlockSpec((outdim, tm), lambda i: (0, i)),  # lane-dense output
        compiler_params=pltpu.CompilerParams(dimension_semantics=("parallel",)),
        cost_estimate=cost,
    )(x_t, w1_t, b1_t, w2_t, b2_t, w3_k, b3_t)

    return out_t[:, :B].T                                  # (B, outdim)


def init_params(key, indim, hidden_layer, outdim, dtype=jnp.float32):
    """Deterministic init matching the module: xavier_normal_ weights,
    uniform(-1, 1) biases.  Weights stored as (fan_in, fan_out)."""
    def xavier_normal(k, fan_in, fan_out):
        std = jnp.sqrt(2.0 / (fan_in + fan_out))
        return (jax.random.normal(k, (fan_in, fan_out), dtype) * std).astype(dtype)

    ks = jax.random.split(key, 6)
    h0, h1 = hidden_layer
    return {
        "w1": xavier_normal(ks[0], indim, h0),
        "b1": jax.random.uniform(ks[1], (1, h0), dtype, minval=-1.0, maxval=1.0),
        "w2": xavier_normal(ks[2], h0, h1),
        "b2": jax.random.uniform(ks[3], (1, h1), dtype, minval=-1.0, maxval=1.0),
        "w3": xavier_normal(ks[4], h1, outdim),
        "b3": jax.random.uniform(ks[5], (1, outdim), dtype, minval=-1.0, maxval=1.0),
    }


def _reference_forward(x, p):
    h = jnp.tanh(x @ p["w1"] + p["b1"])
    h = jnp.tanh(h @ p["w2"] + p["b2"])
    return h @ p["w3"] + p["b3"]


if __name__ == "__main__":
    key = jax.random.PRNGKey(0)
    k_x, k_x2, k_p = jax.random.split(key, 3)

    # Small shapes consistent with the module: indim=1, hidden_layer=[32, 32],
    # outdim=1 (typical scalar-PDE BayesDNN usage), batch=8.
    batch, indim, hidden_layer, outdim = 8, 1, (32, 32), 1

    params = init_params(k_p, indim, hidden_layer, outdim)

    # Tiny batch (module-scale shape).
    x_small = jax.random.normal(k_x, (batch, indim), dtype=jnp.float32)
    out_small = net_2hidden_forward(x_small, params)
    jax.block_until_ready(out_small)
    ref_small = _reference_forward(x_small, params)
    assert out_small.shape == (batch, outdim)
    assert jnp.allclose(out_small, ref_small, atol=1e-4, rtol=1e-4)

    # Larger, non-tile-aligned batch to exercise the streamed multi-tile path.
    big_batch = 5000
    x_big = jax.random.normal(k_x2, (big_batch, indim), dtype=jnp.float32)
    out_big = net_2hidden_forward(x_big, params, tile_m=2048)
    jax.block_until_ready(out_big)
    ref_big = _reference_forward(x_big, params)
    assert out_big.shape == (big_batch, outdim)
    assert jnp.allclose(out_big, ref_big, atol=1e-4, rtol=1e-4)

    print("KERNEL_OK")
</pallas_src>

<mosaic_0001>
module attributes {stable_mosaic.version = 11 : i64} {
  func.func @kernel(%arg0: i32, %arg1: memref<1x128xf32, #tpu.memory_space<vmem>>, %arg2: memref<32x1xf32, #tpu.memory_space<vmem>>, %arg3: memref<32x1xf32, #tpu.memory_space<vmem>>, %arg4: memref<32x32xf32, #tpu.memory_space<vmem>>, %arg5: memref<32x1xf32, #tpu.memory_space<vmem>>, %arg6: memref<32x1xf32, #tpu.memory_space<vmem>>, %arg7: memref<1x1xf32, #tpu.memory_space<vmem>>, %arg8: memref<1x128xf32, #tpu.memory_space<vmem>>) attributes {dimension_semantics = [#tpu.dimension_semantics<parallel>], iteration_bounds = array<i64: 1>, scalar_prefetch = 0 : i64, scratch_operands = 0 : i64, tpu.core_type = #tpu.core_type<tc>, window_params = [{transform_indices = @transform_0, window_bounds = array<i64: 1, 128>}, {pipeline_mode = #tpu.pipeline_mode<synchronous>, transform_indices = @transform_1, window_bounds = array<i64: 32, 1>}, {pipeline_mode = #tpu.pipeline_mode<synchronous>, transform_indices = @transform_2, window_bounds = array<i64: 32, 1>}, {pipeline_mode = #tpu.pipeline_mode<synchronous>, transform_indices = @transform_3, window_bounds = array<i64: 32, 32>}, {pipeline_mode = #tpu.pipeline_mode<synchronous>, transform_indices = @transform_4, window_bounds = array<i64: 32, 1>}, {pipeline_mode = #tpu.pipeline_mode<synchronous>, transform_indices = @transform_5, window_bounds = array<i64: 32, 1>}, {pipeline_mode = #tpu.pipeline_mode<synchronous>, transform_indices = @transform_6, window_bounds = array<i64: 1, 1>}, {transform_indices = @transform_7, window_bounds = array<i64: 1, 128>}]} {
    %c0 = arith.constant 0 : index
    %c0_0 = arith.constant 0 : index
    %0 = vector.load %arg1[%c0, %c0_0] : memref<1x128xf32, #tpu.memory_space<vmem>>, vector<1x128xf32>
    %c0_1 = arith.constant 0 : index
    %c0_2 = arith.constant 0 : index
    %1 = vector.load %arg2[%c0_1, %c0_2] : memref<32x1xf32, #tpu.memory_space<vmem>>, vector<32x1xf32>
    %2 = vector.broadcast %1 : vector<32x1xf32> to vector<32x128xf32>
    %3 = vector.broadcast %0 : vector<1x128xf32> to vector<32x128xf32>
    %4 = arith.mulf %2, %3 : vector<32x128xf32>
    %c0_3 = arith.constant 0 : index
    %c0_4 = arith.constant 0 : index
    %5 = vector.load %arg3[%c0_3, %c0_4] : memref<32x1xf32, #tpu.memory_space<vmem>>, vector<32x1xf32>
    %6 = vector.broadcast %5 : vector<32x1xf32> to vector<32x128xf32>
    %7 = arith.addf %4, %6 : vector<32x128xf32>
    %8 = math.tanh %7 : vector<32x128xf32>
    %c0_5 = arith.constant 0 : index
    %c0_6 = arith.constant 0 : index
    %9 = vector.load %arg4[%c0_5, %c0_6] : memref<32x32xf32, #tpu.memory_space<vmem>>, vector<32x32xf32>
    %cst = arith.constant dense<0.000000e+00> : vector<32x128xf32>
    %10 = tpu.matmul %9, %8, %cst {dimension_numbers = #tpu.dot_dimension_numbers<[1], [0], [0], [1], [0, 0, 1, 1], [], []>} : vector<32x32xf32>, vector<32x128xf32>, vector<32x128xf32> -> vector<32x128xf32>
    %c0_7 = arith.constant 0 : index
    %c0_8 = arith.constant 0 : index
    %11 = vector.load %arg5[%c0_7, %c0_8] : memref<32x1xf32, #tpu.memory_space<vmem>>, vector<32x1xf32>
    %12 = vector.broadcast %11 : vector<32x1xf32> to vector<32x128xf32>
    %13 = arith.addf %10, %12 : vector<32x128xf32>
    %14 = math.tanh %13 : vector<32x128xf32>
    %c0_9 = arith.constant 0 : index
    %c0_10 = arith.constant 0 : index
    %15 = vector.load %arg6[%c0_9, %c0_10] : memref<32x1xf32, #tpu.memory_space<vmem>>, vector<32x1xf32>
    %16 = vector.broadcast %15 : vector<32x1xf32> to vector<32x128xf32>
    %17 = arith.mulf %16, %14 : vector<32x128xf32>
    %cst_11 = arith.constant dense<0.000000e+00> : vector<128xf32>
    %18 = vector.multi_reduction <add>, %17, %cst_11 [0] : vector<32x128xf32> to vector<128xf32>
    %19 = vector.shape_cast %18 : vector<128xf32> to vector<1x128xf32>
    %c0_12 = arith.constant 0 : index
    %c0_13 = arith.constant 0 : index
    %20 = vector.load %arg7[%c0_12, %c0_13] : memref<1x1xf32, #tpu.memory_space<vmem>>, vector<1x1xf32>
    %21 = vector.broadcast %20 : vector<1x1xf32> to vector<1x128xf32>
    %22 = arith.addf %19, %21 : vector<1x128xf32>
    %c0_14 = arith.constant 0 : index
    %c0_15 = arith.constant 0 : index
    %23 = vector.load %arg8[%c0_14, %c0_15] : memref<1x128xf32, #tpu.memory_space<vmem>>, vector<1x128xf32>
    tpu.vector_store %arg8[%c0_14, %c0_15], %22 {strides = array<i32>} : memref<1x128xf32, #tpu.memory_space<vmem>>, vector<1x128xf32>,
    return
  }
  func.func @transform_0(%arg0: i32) -> (i32, i32) {
    %c0_i32 = arith.constant 0 : i32
    %c0_i32_0 = arith.constant 0 : i32
    return %c0_i32, %arg0 : i32, i32
  }
  func.func @transform_1(%arg0: i32) -> (i32, i32) {
    %c0_i32 = arith.constant 0 : i32
    %c0_i32_0 = arith.constant 0 : i32
    %c0_i32_1 = arith.constant 0 : i32
    return %c0_i32, %c0_i32_0 : i32, i32
  }
  func.func @transform_2(%arg0: i32) -> (i32, i32) {
    %c0_i32 = arith.constant 0 : i32
    %c0_i32_0 = arith.constant 0 : i32
    %c0_i32_1 = arith.constant 0 : i32
    return %c0_i32, %c0_i32_0 : i32, i32
  }
  func.func @transform_3(%arg0: i32) -> (i32, i32) {
    %c0_i32 = arith.constant 0 : i32
    %c0_i32_0 = arith.constant 0 : i32
    %c0_i32_1 = arith.constant 0 : i32
    return %c0_i32, %c0_i32_0 : i32, i32
  }
  func.func @transform_4(%arg0: i32) -> (i32, i32) {
    %c0_i32 = arith.constant 0 : i32
    %c0_i32_0 = arith.constant 0 : i32
    %c0_i32_1 = arith.constant 0 : i32
    return %c0_i32, %c0_i32_0 : i32, i32
  }
  func.func @transform_5(%arg0: i32) -> (i32, i32) {
    %c0_i32 = arith.constant 0 : i32
    %c0_i32_0 = arith.constant 0 : i32
    %c0_i32_1 = arith.constant 0 : i32
    return %c0_i32, %c0_i32_0 : i32, i32
  }
  func.func @transform_6(%arg0: i32) -> (i32, i32) {
    %c0_i32 = arith.constant 0 : i32
    %c0_i32_0 = arith.constant 0 : i32
    %c0_i32_1 = arith.constant 0 : i32
    return %c0_i32, %c0_i32_0 : i32, i32
  }
  func.func @transform_7(%arg0: i32) -> (i32, i32) {
    %c0_i32 = arith.constant 0 : i32
    %c0_i32_0 = arith.constant 0 : i32
    return %c0_i32, %arg0 : i32, i32
  }
}

</mosaic_0001>

<bundles_post_ra>
// kernel: tpu_custom_call.1
= control target key start
LH: loop header
LB: loop body
LE: loop exit
PB: predicated region body
PF: predicated region fallthrough
CT: control target
= control target key end

     0   :  { %s404_s0 = inlined_call_operand.vmem [shape: f32[1,128], index: 0, kind: input, shape index: {}]   ;;  %s405_s1 = inlined_call_operand.vmem [shape: f32[32,1], index: 1, kind: input, shape index: {}]   ;;  %s406_s2 = inlined_call_operand.vmem [shape: f32[32,1], index: 2, kind: input, shape index: {}]   ;;  %s407_s3 = inlined_call_operand.vmem [shape: f32[32,32], index: 3, kind: input, shape index: {}]   ;;  %s408_s4 = inlined_call_operand.vmem [shape: f32[32,1], index: 4, kind: input, shape index: {}]   ;;  %s409_s5 = inlined_call_operand.vmem [shape: f32[32,1], index: 5, kind: input, shape index: {}]   ;;  %s410_s6 = inlined_call_operand.<no memory space> [shape: f32[1,1], index: 6, kind: input, shape index: {}]   ;;  %s411_s7 = inlined_call_operand.hbm [shape: f32[1,128], index: 7, kind: output, shape index: {}]  }
   0x1   :  { %v12_v0 = vstv %s410_s6 }
   0x2   :  { %13 = vst [vmem:[#allocation2] sm:$0x1] %v12_v0 }
   0x3   :  { %v63_v1 = vld [vmem:[%s406_s2 + $0x10] sm:$0xff]  ;;  %v64_v2 = vld [vmem:[%s406_s2 + $0x18] sm:$0xff]  ;;  %v293_v4 = vmov 0  }
   0x4   :  { %v33_v3 = vld [vmem:[%s405_s1 + $0x18] sm:$0xff]  ;;  %249 = vset.pattern.permute.xlu2 %v293_v4  ;;  %248 = vset.pattern.permute.xlu1 %v293_v4 }
   0x5   :  { %247 = vset.pattern.permute.xlu0 %v293_v4  ;;  %77 = vperm.xlu2 %249, %v63_v1  }
   0x6   :  { %82 = vperm.xlu1 %248, %v64_v2   ;;  %51 = vperm.xlu0 %247, %v33_v3  }
   0x7   :  { %14 = vsyncpa [#allocation4], 0  ;;  %v30_v5 = vld [vmem:[%s405_s1] sm:$0xff]  ;;  %v32_v6 = vld [vmem:[%s405_s1 + $0x10] sm:$0xff]  ;;  %vm121_vm0 = vcmask 261120   ;;  %s220_s18 = sshll.u32 %s411_s7, 4  ;;  %s221_s18 = int_to_ptr.hbm [resolvable:$true] %s220_s18 }
   0x8   :  { %v31_v7 = vld [vmem:[%s405_s1 + $0x8] sm:$0xff]  ;;  %v97_v8 = vld [vmem:[%s408_s4] sm:$0xff]  ;;  %v100_v11 = vld [vmem:[%s408_s4 + $0x18] sm:$0xff] }
   0x9   :  { %v62_v9 = vld [vmem:[%s406_s2 + $0x8] sm:$0xff]  ;;  %v61_v10 = vld [vmem:[%s406_s2] sm:$0xff]  ;;  %v99_v13 = vld [vmem:[%s408_s4 + $0x10] sm:$0xff] }
   0xa   :  { %v98_v12 = vld [vmem:[%s408_s4 + $0x8] sm:$0xff]  ;;  %v169_v14 = vld [vmem:[%s409_s5 + $0x10] sm:$0xff]  ;;  %v167_v15 = vld [vmem:[%s409_s5] sm:$0xff] }
   0xb   :  { %v168_v16 = vld [vmem:[%s409_s5 + $0x8] sm:$0xff]  ;;  %v170_v17 = vld [vmem:[%s409_s5 + $0x18] sm:$0xff]  ;;  %v204_v18 = vld [vmem:[#allocation2] sm:$0x1] }
   0xc   :  { %v250_v19 = vld [vmem:[%s404_s0] ss:$0 sm:$0xff]  ;;  %v94_v41 = vld [vmem:[%s407_s3 + $0x8] sm:$0xff]  ;;  %v95_v42 = vld [vmem:[%s407_s3 + $0x10] sm:$0xff] }
   0xd   :  { %36 = vperm.xlu2 %249, %v30_v5   ;;  %v93_v40 = vld [vmem:[%s407_s3] sm:$0xff]  ;;  %v96_v43 = vld [vmem:[%s407_s3 + $0x18] sm:$0xff]  ;;  %s294_s3 = smov [#allocation3]  }
   0xe   :  { %46 = vperm.xlu0 %247, %v32_v6   ;;  %41 = vperm.xlu1 %248, %v31_v7   ;;  %s218_s15 = sshll.u32 %s294_s3, 4  ;;  %s219_s15 = int_to_ptr.vmem [resolvable:$true] %s218_s15 }
  0x15   :  { %103 = vperm.xlu2 %249, %v97_v8  }
  0x16   :  { %72 = vperm.xlu0 %247, %v62_v9   ;;  %67 = vperm.xlu1 %248, %v61_v10  }
  0x1d   :  { %118 = vperm.xlu2 %249, %v100_v11  }
  0x1e   :  { %108 = vperm.xlu0 %247, %v98_v12   ;;  %113 = vperm.xlu1 %248, %v99_v13  }
  0x25   :  { %183 = vperm.xlu2 %249, %v169_v14  }
  0x26   :  { %173 = vperm.xlu0 %247, %v167_v15   ;;  %178 = vperm.xlu1 %248, %v168_v16  }
  0x2e   :  { %188 = vperm.xlu0 %247, %v170_v17   ;;  %207 = vperm.xlu1 %248, %v204_v18  }
  0x5f   :  { %v78_v24 = vpop.permute.xlu2 %77 }
  0x67   :  { %v37_v30 = vpop.permute.xlu2 %36 }
  0x68   :  { %v57_v31 = vmul.f32 %v250_v19, %v37_v30 }
  0x6f   :  { %v104_v44 = vpop.permute.xlu2 %103 }
  0x77   :  { %v119_v51 = vpop.permute.xlu2 %118 }
  0x78   :  { %v83_v20 = vpop.permute.xlu1 %82  ;;  %v52_v21 = vpop.permute.xlu0 %51 }
  0x79   :  { %v60_v22 = vmul.f32 %v250_v19, %v52_v21 }
  0x7b   :  { %v88_v23 = vadd.f32 %v83_v20, %v60_v22 }
  0x7d   :  { %251 = vtanh.f32 %v88_v23 }
  0x7f   :  { %v184_v63 = vpop.permute.xlu2 %183 }
  0x80   :  { %v47_v25 = vpop.permute.xlu0 %46  ;;  %v42_v26 = vpop.permute.xlu1 %41 }
  0x81   :  { %v59_v27 = vmul.f32 %v250_v19, %v47_v25  ;;  %v58_v32 = vmul.f32 %v250_v19, %v42_v26 }
  0x83   :  { %v252_v28 = vpop.eup %251  ;;  %v87_v29 = vadd.f32 %v78_v24, %v59_v27 }
  0x84   :  { %146 = vmatpush.msra.mxu0 %v252_v28  ;;  %233 = vmatpush.msra.mxu1 %v252_v28 }
  0x85   :  { %253 = vtanh.f32 %v87_v29  ;;  %234 = vmatpush.msra.mxu2 %v252_v28  ;;  %235 = vmatpush.msra.mxu3 %v252_v28 }
  0x88   :  { %v73_v33 = vpop.permute.xlu0 %72  ;;  %v68_v34 = vpop.permute.xlu1 %67 }
  0x89   :  { %v86_v35 = vadd.f32 %v73_v33, %v58_v32  ;;  %v85_v36 = vadd.f32 %v68_v34, %v57_v31 }
  0x8b   :  { %v254_v37 = vpop.eup %253  ;;  %255 = vtanh.f32 %v86_v35 }
  0x8c   :  { %147 = vmatpush.msra.mxu0 %v254_v37  ;;  %236 = vmatpush.msra.mxu1 %v254_v37  ;;  %257 = vtanh.f32 %v85_v36 }
  0x8d   :  { %237 = vmatpush.msra.mxu2 %v254_v37  ;;  %238 = vmatpush.msra.mxu3 %v254_v37 }
  0x90   :  { %v109_v45 = vpop.permute.xlu0 %108  ;;  %v114_v50 = vpop.permute.xlu1 %113 }
  0x91   :  { %v256_v38 = vpop.eup %255 }
  0x92   :  { %148 = vmatpush.msra.mxu0 %v256_v38  ;;  %239 = vmatpush.msra.mxu1 %v256_v38  ;;  %v258_v39 = vpop.eup %257 }
  0x93   :  { %240 = vmatpush.msra.mxu2 %v256_v38  ;;  %241 = vmatpush.msra.mxu3 %v256_v38 }
  0x94   :  { %149 = vmatpush.msra.mxu0 %v258_v39  ;;  %242 = vmatpush.msra.mxu1 %v258_v39 }
  0x95   :  { %243 = vmatpush.msra.mxu2 %v258_v39  ;;  %244 = vmatpush.msra.mxu3 %v258_v39 }
  0x96   :  { %229 = vmatmul.msk.f32.vlgmr.msra.gmra.mxu0 %vm121_vm0, %v93_v40  ;;  %230 = vmatmul.msk.f32.vlgmr.msra.gmra.mxu1 %vm121_vm0, %v94_v41 }
  0x97   :  { %231 = vmatmul.msk.f32.vlgmr.msra.gmra.mxu2 %vm121_vm0, %v95_v42  ;;  %232 = vmatmul.msk.f32.vlgmr.msra.gmra.mxu3 %vm121_vm0, %v96_v43 }
  0x98   :  { %v174_v54 = vpop.permute.xlu0 %173  ;;  %v179_v59 = vpop.permute.xlu1 %178 }
  0xa0   :  { %v189_v3 = vpop.permute.xlu0 %188  ;;  %v208_v11 = vpop.permute.xlu1 %207 }
  0xa1   :  { %v210_v13 = vperm.slane %v208_v11, 0 }
 0x113   :  { %v151_v46 = vpop.f32.mrf.mxu0  ;;  %v154_v47 = vpop.f32.mrf.mxu1 }
 0x114   :  { %v152_v48 = vadd.f32 %v151_v46, %v104_v44  ;;  %v155_v49 = vadd.f32 %v154_v47, %v109_v45 }
 0x116   :  { %259 = vtanh.f32 %v152_v48 }
 0x117   :  { %261 = vtanh.f32 %v155_v49 }
 0x11a   :  { %v157_v52 = vpop.f32.mrf.mxu2  ;;  %v160_v53 = vpop.f32.mrf.mxu3 }
 0x11b   :  { %v158_v55 = vadd.f32 %v157_v52, %v114_v50  ;;  %v161_v56 = vadd.f32 %v160_v53, %v119_v51 }
 0x11c   :  { %v260_v57 = vpop.eup %259 }
 0x11d   :  { %v262_v58 = vpop.eup %261  ;;  %263 = vtanh.f32 %v158_v55  ;;  %v191_v60 = vmul.f32 %v260_v57, %v174_v54 }
 0x11e   :  { %265 = vtanh.f32 %v161_v56  ;;  %v192_v61 = vmul.f32 %v262_v58, %v179_v59 }
 0x120   :  { %v195_v1 = vadd.f32 %v192_v61, %v191_v60 }
 0x123   :  { %v264_v62 = vpop.eup %263 }
 0x124   :  { %v266_v0 = vpop.eup %265  ;;  %v193_v2 = vmul.f32 %v264_v62, %v184_v63 }
 0x125   :  { %v194_v5 = vmul.f32 %v266_v0, %v189_v3 }
 0x126   :  { %v196_v4 = vadd.f32 %v195_v1, %v193_v2 }
 0x128   :  { %v197_v6 = vadd.f32 %v196_v4, %v194_v5 }
 0x12a   :  { %v198_v7 = vrot.slane %v197_v6, 4 }
 0x12c   :  { %v199_v8 = vadd.f32 %v198_v7, %v197_v6 }
 0x12e   :  { %v200_v9 = vrot.slane %v199_v8, 2 }
 0x130   :  { %v201_v10 = vadd.f32 %v200_v9, %v199_v8 }
 0x132   :  { %v202_v12 = vrot.slane %v201_v10, 1 }
 0x134   :  { %v203_v14 = vadd.f32 %v202_v12, %v201_v10 }
 0x136   :  { %v211_v15 = vadd.f32 %v210_v13, %v203_v14 }
 0x138   :  { %212 = vst [vmem:[#allocation3] sm:$0x1] %v211_v15 }
 0x139   :  { %223 = dma.vmem_to_hbm [thread:$0]  %s219_s15, 16, %s221_s18, [#allocation4]  }
 0x13a   :  { %291 = dma.done.wait [#allocation4], 16  }
 0x13b   :  { %292 = vsyncadd [#allocation4], 4294967280 }
 0x13c   :  { %228 = vsyncpa [#allocation4], 1 }

</bundles_post_ra>
